<compile_context>
chip_gen: v7x
topology: tpu7x:2x2x1
jax: 0.10.0
libtpu: 0.0.40
codegen_flags: <defaults>
</compile_context>

<pallas_src>
import functools

import jax
import jax.numpy as jnp
from jax.experimental import pallas as pl
from jax.experimental.pallas import tpu as pltpu


def barrier_mlp_kernel(x_ref, w1_ref, b1_ref, w2_ref, b2_ref, w3_ref, b3_ref,
                       out_ref):
    """Whole MLP forward on one batch tile, batch on the lane axis.

    x_ref  : (state_dim, BT)
    wN_ref : (out_dim, in_dim)   (PyTorch layout)
    bN_ref : (out_dim, 1)        (broadcasts over the batch lanes)
    out_ref: (1, BT)
    """
    x = x_ref[...]
    h1 = jnp.tanh(
        jnp.dot(w1_ref[...], x, preferred_element_type=jnp.float32) + b1_ref[...])
    h2 = jnp.tanh(
        jnp.dot(w2_ref[...], h1, preferred_element_type=jnp.float32) + b2_ref[...])
    b = jnp.dot(w3_ref[...], h2, preferred_element_type=jnp.float32) + b3_ref[...]
    out_ref[...] = b.astype(out_ref.dtype)


def _pick_batch_tile(batch, bt_max):
    """Lane-axis batch tile.

    * batch <= 128: a single full-extent block (no 128-alignment needed when
      the block equals the array dim).
    * otherwise: a multiple of 128, capped at bt_max, and at most batch//2 so
      the grid has >=2 steps (keeps both v7x TensorCores busy and preserves
      input/output double-buffer overlap).
    """
    if batch <= 128:
        return batch
    half = (batch // 2) // 128 * 128
    return max(128, min(bt_max, half))


@functools.partial(jax.jit, static_argnames=("bt_max",))
def barrier_forward(x, params, *, bt_max=8192):
    """B(x) for x:(batch, state_dim) -> (batch, 1).

    params : (w1, b1, w2, b2, w3, b3) with wN (out, in) and bN (out,).
    The astype/transpose relayout and the final output transpose live under
    this jit together with the pallas_call (no standalone HBM passes).
    """
    w1, b1, w2, b2, w3, b3 = params
    batch, state_dim = x.shape
    h1 = w1.shape[0]
    h2 = w2.shape[0]

    bt = _pick_batch_tile(batch, bt_max)
    n_steps = pl.cdiv(batch, bt)

    # Batch on lanes. No explicit padding: Pallas clips the ragged last block.
    x_t = x.astype(jnp.float32).T                       # (state_dim, batch)

    # Biases as (out, 1) columns: broadcast along the lane (batch) axis in-kernel.
    b1c = b1.reshape(h1, 1).astype(jnp.float32)
    b2c = b2.reshape(h2, 1).astype(jnp.float32)
    b3c = b3.reshape(1, 1).astype(jnp.float32)

    def resident_spec(shape):
        # Constant block index -> fetched once, stays VMEM-resident across the grid.
        return pl.BlockSpec(shape, lambda i: (0, 0))

    weight_elems = state_dim * h1 + h1 * h2 + h2 + h1 + h2 + 1
    cost = pl.CostEstimate(
        flops=2 * batch * (state_dim * h1 + h1 * h2 + h2),
        transcendentals=batch * (h1 + h2),
        bytes_accessed=4 * (batch * (state_dim + 1) + weight_elems),
    )

    # Only raise the scoped-VMEM limit if a large bt_max sweep actually needs
    # it (v5e's 16 MiB default is the tightest); default tiles stay ~4.5 MiB.
    compiler_kwargs = dict(dimension_semantics=("parallel",))
    est_vmem_bytes = 4 * bt * (2 * state_dim + 2 + h1 + h2) + 8 * 4 * weight_elems
    if est_vmem_bytes > 12 * 1024 * 1024:
        compiler_kwargs["vmem_limit_bytes"] = min(
            int(est_vmem_bytes * 3 // 2), 48 * 1024 * 1024)

    out_t = pl.pallas_call(
        barrier_mlp_kernel,
        out_shape=jax.ShapeDtypeStruct((1, batch), jnp.float32),
        grid_spec=pltpu.PrefetchScalarGridSpec(
            num_scalar_prefetch=0,
            grid=(n_steps,),
            in_specs=[
                pl.BlockSpec((state_dim, bt), lambda i: (0, i)),   # streamed input
                resident_spec((h1, state_dim)), resident_spec((h1, 1)),
                resident_spec((h2, h1)),        resident_spec((h2, 1)),
                resident_spec((1, h2)),         resident_spec((1, 1)),
            ],
            out_specs=pl.BlockSpec((1, bt), lambda i: (0, i)),     # lane-dense store
        ),
        compiler_params=pltpu.CompilerParams(**compiler_kwargs),
        cost_estimate=cost,
    )(x_t, w1.astype(jnp.float32), b1c, w2.astype(jnp.float32), b2c,
      w3.astype(jnp.float32), b3c)

    # (1, batch) -> (batch, 1), fused under the same jit.
    return out_t.T


def init_params(key, state_dim, hidden_layers):
    """'normal' init (mean=0, std=0.1) weights, zero biases — PyTorch (out, in) layout."""
    dims = [state_dim] + list(hidden_layers) + [1]
    params = []
    for i in range(len(dims) - 1):
        key, sub = jax.random.split(key)
        w = 0.1 * jax.random.normal(sub, (dims[i + 1], dims[i]), dtype=jnp.float32)
        b = jnp.zeros((dims[i + 1],), dtype=jnp.float32)
        params += [w, b]
    return tuple(params)


def reference_forward(x, params):
    """Plain-JAX reference of the same forward pass (PyTorch layout: x @ W.T + b)."""
    w1, b1, w2, b2, w3, b3 = params
    h = jnp.tanh(x @ w1.T + b1)
    h = jnp.tanh(h @ w2.T + b2)
    return h @ w3.T + b3


# TODO(synk): gradient()/verify_condition() (autograd-based) are not kernels;
# use jax.grad / jax.jacrev around barrier_forward outside the Pallas call.

if __name__ == "__main__":
    key = jax.random.PRNGKey(0)
    state_dim = 4
    hidden_layers = [64, 64]          # module default

    pkey, xkey = jax.random.split(key)
    params = init_params(pkey, state_dim, hidden_layers)

    # Multi-step grid: batch=512 -> BT=256 -> 2 grid steps (shards across v7x TCs).
    x = jax.random.normal(xkey, (512, state_dim), dtype=jnp.float32)
    out = jax.block_until_ready(barrier_forward(x, params))
    ref = reference_forward(x, params)
    assert out.shape == (512, 1), out.shape
    assert jnp.allclose(out, ref, atol=1e-5, rtol=1e-5), (
        f"max abs err {jnp.max(jnp.abs(out - ref))}")

    # Ragged last block: batch=300 -> BT=128 -> 3 steps, last block clipped.
    x_r = x[:300]
    out_r = jax.block_until_ready(barrier_forward(x_r, params))
    assert out_r.shape == (300, 1)
    assert jnp.allclose(out_r, reference_forward(x_r, params), atol=1e-5, rtol=1e-5)

    # Tiny batch: single full-extent block (no 128 alignment needed).
    x_s = x[:7]
    out_s = jax.block_until_ready(barrier_forward(x_s, params))
    assert out_s.shape == (7, 1)
    assert jnp.allclose(out_s, reference_forward(x_s, params), atol=1e-5, rtol=1e-5)

    print("KERNEL_OK")
</pallas_src>

<mosaic_0001>
module attributes {stable_mosaic.version = 11 : i64} {
  func.func @barrier_mlp_kernel(%arg0: i32, %arg1: memref<4x256xf32, #tpu.memory_space<vmem>>, %arg2: memref<64x4xf32, #tpu.memory_space<vmem>>, %arg3: memref<64x1xf32, #tpu.memory_space<vmem>>, %arg4: memref<64x64xf32, #tpu.memory_space<vmem>>, %arg5: memref<64x1xf32, #tpu.memory_space<vmem>>, %arg6: memref<1x64xf32, #tpu.memory_space<vmem>>, %arg7: memref<1x1xf32, #tpu.memory_space<vmem>>, %arg8: memref<1x256xf32, #tpu.memory_space<vmem>>) attributes {dimension_semantics = [#tpu.dimension_semantics<parallel>], iteration_bounds = array<i64: 2>, scalar_prefetch = 0 : i64, scratch_operands = 0 : i64, tpu.core_type = #tpu.core_type<tc>, window_params = [{transform_indices = @transform_0, window_bounds = array<i64: 4, 256>}, {pipeline_mode = #tpu.pipeline_mode<synchronous>, transform_indices = @transform_1, window_bounds = array<i64: 64, 4>}, {pipeline_mode = #tpu.pipeline_mode<synchronous>, transform_indices = @transform_2, window_bounds = array<i64: 64, 1>}, {pipeline_mode = #tpu.pipeline_mode<synchronous>, transform_indices = @transform_3, window_bounds = array<i64: 64, 64>}, {pipeline_mode = #tpu.pipeline_mode<synchronous>, transform_indices = @transform_4, window_bounds = array<i64: 64, 1>}, {pipeline_mode = #tpu.pipeline_mode<synchronous>, transform_indices = @transform_5, window_bounds = array<i64: 1, 64>}, {pipeline_mode = #tpu.pipeline_mode<synchronous>, transform_indices = @transform_6, window_bounds = array<i64: 1, 1>}, {transform_indices = @transform_7, window_bounds = array<i64: 1, 256>}]} {
    %c0 = arith.constant 0 : index
    %c0_0 = arith.constant 0 : index
    %0 = vector.load %arg1[%c0, %c0_0] : memref<4x256xf32, #tpu.memory_space<vmem>>, vector<4x256xf32>
    %c0_1 = arith.constant 0 : index
    %c0_2 = arith.constant 0 : index
    %1 = vector.load %arg2[%c0_1, %c0_2] : memref<64x4xf32, #tpu.memory_space<vmem>>, vector<64x4xf32>
    %cst = arith.constant dense<0.000000e+00> : vector<64x256xf32>
    %2 = tpu.matmul %1, %0, %cst {dimension_numbers = #tpu.dot_dimension_numbers<[1], [0], [0], [1], [0, 0, 1, 1], [], []>} : vector<64x4xf32>, vector<4x256xf32>, vector<64x256xf32> -> vector<64x256xf32>
    %c0_3 = arith.constant 0 : index
    %c0_4 = arith.constant 0 : index
    %3 = vector.load %arg3[%c0_3, %c0_4] : memref<64x1xf32, #tpu.memory_space<vmem>>, vector<64x1xf32>
    %4 = vector.broadcast %3 : vector<64x1xf32> to vector<64x256xf32>
    %5 = arith.addf %2, %4 : vector<64x256xf32>
    %6 = math.tanh %5 : vector<64x256xf32>
    %c0_5 = arith.constant 0 : index
    %c0_6 = arith.constant 0 : index
    %7 = vector.load %arg4[%c0_5, %c0_6] : memref<64x64xf32, #tpu.memory_space<vmem>>, vector<64x64xf32>
    %cst_7 = arith.constant dense<0.000000e+00> : vector<64x256xf32>
    %8 = tpu.matmul %7, %6, %cst_7 {dimension_numbers = #tpu.dot_dimension_numbers<[1], [0], [0], [1], [0, 0, 1, 1], [], []>} : vector<64x64xf32>, vector<64x256xf32>, vector<64x256xf32> -> vector<64x256xf32>
    %c0_8 = arith.constant 0 : index
    %c0_9 = arith.constant 0 : index
    %9 = vector.load %arg5[%c0_8, %c0_9] : memref<64x1xf32, #tpu.memory_space<vmem>>, vector<64x1xf32>
    %10 = vector.broadcast %9 : vector<64x1xf32> to vector<64x256xf32>
    %11 = arith.addf %8, %10 : vector<64x256xf32>
    %12 = math.tanh %11 : vector<64x256xf32>
    %c0_10 = arith.constant 0 : index
    %c0_11 = arith.constant 0 : index
    %13 = vector.load %arg6[%c0_10, %c0_11] : memref<1x64xf32, #tpu.memory_space<vmem>>, vector<1x64xf32>
    %cst_12 = arith.constant dense<0.000000e+00> : vector<1x256xf32>
    %14 = tpu.matmul %13, %12, %cst_12 {dimension_numbers = #tpu.dot_dimension_numbers<[1], [0], [0], [1], [0, 0, 1, 1], [], []>} : vector<1x64xf32>, vector<64x256xf32>, vector<1x256xf32> -> vector<1x256xf32>
    %c0_13 = arith.constant 0 : index
    %c0_14 = arith.constant 0 : index
    %15 = vector.load %arg7[%c0_13, %c0_14] : memref<1x1xf32, #tpu.memory_space<vmem>>, vector<1x1xf32>
    %16 = vector.broadcast %15 : vector<1x1xf32> to vector<1x256xf32>
    %17 = arith.addf %14, %16 : vector<1x256xf32>
    %c0_15 = arith.constant 0 : index
    %c0_16 = arith.constant 0 : index
    %18 = vector.load %arg8[%c0_15, %c0_16] : memref<1x256xf32, #tpu.memory_space<vmem>>, vector<1x256xf32>
    tpu.vector_store %arg8[%c0_15, %c0_16], %17 {strides = array<i32>} : memref<1x256xf32, #tpu.memory_space<vmem>>, vector<1x256xf32>,
    return
  }
  func.func @transform_0(%arg0: i32) -> (i32, i32) {
    %c0_i32 = arith.constant 0 : i32
    %c0_i32_0 = arith.constant 0 : i32
    return %c0_i32, %arg0 : i32, i32
  }
  func.func @transform_1(%arg0: i32) -> (i32, i32) {
    %c0_i32 = arith.constant 0 : i32
    %c0_i32_0 = arith.constant 0 : i32
    %c0_i32_1 = arith.constant 0 : i32
    return %c0_i32, %c0_i32_0 : i32, i32
  }
  func.func @transform_2(%arg0: i32) -> (i32, i32) {
    %c0_i32 = arith.constant 0 : i32
    %c0_i32_0 = arith.constant 0 : i32
    %c0_i32_1 = arith.constant 0 : i32
    return %c0_i32, %c0_i32_0 : i32, i32
  }
  func.func @transform_3(%arg0: i32) -> (i32, i32) {
    %c0_i32 = arith.constant 0 : i32
    %c0_i32_0 = arith.constant 0 : i32
    %c0_i32_1 = arith.constant 0 : i32
    return %c0_i32, %c0_i32_0 : i32, i32
  }
  func.func @transform_4(%arg0: i32) -> (i32, i32) {
    %c0_i32 = arith.constant 0 : i32
    %c0_i32_0 = arith.constant 0 : i32
    %c0_i32_1 = arith.constant 0 : i32
    return %c0_i32, %c0_i32_0 : i32, i32
  }
  func.func @transform_5(%arg0: i32) -> (i32, i32) {
    %c0_i32 = arith.constant 0 : i32
    %c0_i32_0 = arith.constant 0 : i32
    %c0_i32_1 = arith.constant 0 : i32
    return %c0_i32, %c0_i32_0 : i32, i32
  }
  func.func @transform_6(%arg0: i32) -> (i32, i32) {
    %c0_i32 = arith.constant 0 : i32
    %c0_i32_0 = arith.constant 0 : i32
    %c0_i32_1 = arith.constant 0 : i32
    return %c0_i32, %c0_i32_0 : i32, i32
  }
  func.func @transform_7(%arg0: i32) -> (i32, i32) {
    %c0_i32 = arith.constant 0 : i32
    %c0_i32_0 = arith.constant 0 : i32
    return %c0_i32, %arg0 : i32, i32
  }
}

</mosaic_0001>

<bundles_post_ra>
// kernel: barrier_forward.1
= control target key start
LH: loop header
LB: loop body
LE: loop exit
PB: predicated region body
PF: predicated region fallthrough
CT: control target
= control target key end

     0   :  { %s1408_s0 = inlined_call_operand.vmem [shape: f32[4,512], index: 0, kind: input, shape index: {}]   ;;  %s1409_s1 = inlined_call_operand.vmem [shape: f32[64,4], index: 1, kind: input, shape index: {}]   ;;  %s1410_s2 = inlined_call_operand.vmem [shape: f32[64,1], index: 2, kind: input, shape index: {}]   ;;  %s1411_s3 = inlined_call_operand.vmem [shape: f32[64,64], index: 3, kind: input, shape index: {}]   ;;  %s1412_s4 = inlined_call_operand.vmem [shape: f32[64,1], index: 4, kind: input, shape index: {}]   ;;  %s1413_s5 = inlined_call_operand.vmem [shape: f32[1,64], index: 5, kind: input, shape index: {}]   ;;  %s1414_s6 = inlined_call_operand.<no memory space> [shape: f32[1,1], index: 6, kind: input, shape index: {}]   ;;  %s1415_s7 = inlined_call_operand.hbm [shape: f32[1,512], index: 7, kind: output, shape index: {}]  }
   0x1   :  { %v12_v0 = vstv %s1414_s6 }
   0x2   :  { %13 = vst [vmem:[#allocation2] sm:$0x1] %v12_v0 }
   0x3   :  { %14 = vsyncpa [#allocation4], 0 }
   0x4   :  { %16 = vsyncpa [#allocation4 + $0x1], 0  ;;  %s1176_s26 = smov 0   ;;  %s1178_s27 = smov 0  }
   0x5   :  { %s1180_s28 = smov 0   ;;  %s1182_s29 = smov 0  }
   0x6 LB: > { %s1197_s6 = sadd.s32 4294967295, %s1127_s29   ;;  %s892_s30 = sadd.s32 4294967294, %s1127_s29   ;;  %s1127_s29 = sphi %s1182_s29, %s1421_s29   ;;  %s1123_s28 = sphi %s1180_s28, %s1420_s28   ;;  %s1119_s27 = sphi %s1178_s27, %s1419_s27   ;;  %s1115_s26 = sphi %s1176_s26, %s1418_s26  }
   0x7   : > { %s1201_s8 = sadd.s32 1, %s1127_s29   ;;  %s181_s9 = sadd.s32 1, %s1123_s28 }
   0x8   : > { %s178_s10 = ssub.s32 %s1127_s29, %s1201_s8  ;;  %p191_p0 = scmp.ne.s32.totalorder %s1123_s28, %s1119_s27 }
   0x9   : > { %p179_p1 = scmp.eq.s32.totalorder %s178_s10, 0  ;;  %p192_p2 = scmp.eq.s32.totalorder %s1197_s6, 1 }
   0xa   : > { %p197_p3 = scmp.ne.s32.totalorder %s1119_s27, %s1115_s26  ;;  %p198_p4 = scmp.eq.s32.totalorder %s892_s30, 1 }
   0xb   : > { %s1212_s11 = scalar_select %p179_p1, %s1123_s28, %s181_s9  }
   0xc   : > { %p1214_p5 = por %p192_p2, %p191_p0  ;;  %p1218_p6 = por %p198_p4, %p197_p3 }
   0xd   : > { %p895_p7 = scmp.ge.s32.totalorder %s1127_s29, 1  ;;  %p243_p8 = scmp.lt.s32.totalorder %s1127_s29, 3 }
   0xf   : > { %p244_p9 = pnand %p895_p7, %p243_p8 }
  0x10   : > { %s897_s14 = sshll.u32 (!%p244_p9), %s1197_s6, 1  ;;  %v1129_v1 = vmov (!%p244_p9), 0.0   ;;  %v1130_v2 = vmov (!%p244_p9), 0   ;;  %v291_v3 = vld [vmem:[%s1410_s2] sm:$0xff] (!%p244_p9)  ;;  %v293_v4 = vld [vmem:[%s1410_s2 + $0x10] sm:$0xff] (!%p244_p9)  ;;  %v292_v5 = vld [vmem:[%s1410_s2 + $0x8] sm:$0xff] (!%p244_p9) }
  0x11   : > { %247 = sbr.rel (%p244_p9) target bundleno = 787 (0x313), region = 48  ;;  %p276_p10 = scmp.lt.s32.totalorder (!%p244_p9), %s897_s14, 3  ;;  %435 = vmatprep.mubr.f32.mxu0 (!%p244_p9), %v1129_v1  ;;  %645 = vmatprep.mubr.f32.mxu1 (!%p244_p9), %v1129_v1  ;;  %v294_v6 = vld [vmem:[%s1410_s2 + $0x18] sm:$0xff] (!%p244_p9)  ;;  %vm366_vm0 = vcmask (!%p244_p9), 1043456   ;;  %v283_v9 = vld [vmem:[%s1409_s1] sm:$0xff] (!%p244_p9)  ;;  %vm341_vm1 = vcmask (!%p244_p9), 31744  }
  0x12   : > { %998 = vset.pattern.permute.xlu0 (!%p244_p9), %v1130_v2  ;;  %999 = vset.pattern.permute.xlu1 (!%p244_p9), %v1130_v2  ;;  %v295_v10 = vld [vmem:[%s1410_s2 + $0x20] sm:$0xff] (!%p244_p9)  ;;  %v296_v11 = vld [vmem:[%s1410_s2 + $0x28] sm:$0xff] (!%p244_p9)  ;;  %v297_v13 = vld [vmem:[%s1410_s2 + $0x30] sm:$0xff] (!%p244_p9)  ;;  %vm556_vm2 = vcmask (!%p244_p9), 523264   ;;  %s272_s25 = sand.u32 (!%p244_p9), 1, %s1119_s27   ;;  %s923_s9 = sshll.u32 (!%p244_p9), %s1197_s6, 5 }
  0x13   : > { %301 = vperm.xlu0 (!%p244_p9), %998, %v291_v3   ;;  %311 = vperm.xlu1 (!%p244_p9), %999, %v293_v4   ;;  %v284_v12 = vld [vmem:[%s1409_s1 + $0x8] sm:$0xff] (!%p244_p9)  ;;  %v298_v14 = vld [vmem:[%s1410_s2 + $0x38] sm:$0xff] (!%p244_p9)  ;;  %v285_v15 = vld [vmem:[%s1409_s1 + $0x10] sm:$0xff] (!%p244_p9)  ;;  %s1366_s17 = scalar_lea.hbm (!%p244_p9), %s1415_s7, %s923_s9  ;;  %s819_s18 = scalar_lea.sflag (!%p244_p9), [#allocation4], %s272_s25 }
  0x14   : > { %v508_v16 = vld [vmem:[%s1412_s4] sm:$0xff] (!%p244_p9)  ;;  %v509_v17 = vld [vmem:[%s1412_s4 + $0x8] sm:$0xff] (!%p244_p9)  ;;  %v286_v18 = vld [vmem:[%s1409_s1 + $0x18] sm:$0xff] (!%p244_p9)  ;;  %s1132_s6 = smov (!%p244_p9), [#allocation3]  }
  0x15   : > { %v510_v19 = vld [vmem:[%s1412_s4 + $0x10] sm:$0xff] (!%p244_p9)  ;;  %v511_v20 = vld [vmem:[%s1412_s4 + $0x18] sm:$0xff] (!%p244_p9)  ;;  %v287_v21 = vld [vmem:[%s1409_s1 + $0x20] sm:$0xff] (!%p244_p9)  ;;  %s1069_s20 = sshll.u32 (!%p244_p9), %s1132_s6, 4  ;;  %s1070_s20 = int_to_ptr.vmem [resolvable:$false] %s1069_s20 }
  0x16   : > { %v512_v22 = vld [vmem:[%s1412_s4 + $0x20] sm:$0xff] (!%p244_p9)  ;;  %v513_v23 = vld [vmem:[%s1412_s4 + $0x28] sm:$0xff] (!%p244_p9)  ;;  %v514_v25 = vld [vmem:[%s1412_s4 + $0x30] sm:$0xff] (!%p244_p9)  ;;  %s1071_s21 = scalar_lea.vmem (!%p244_p9), %s1070_s20, 64 }
  0x17   : > { %306 = vperm.xlu0 (!%p244_p9), %998, %v292_v5   ;;  %316 = vperm.xlu1 (!%p244_p9), %999, %v294_v6   ;;  %v288_v24 = vld [vmem:[%s1409_s1 + $0x28] sm:$0xff] (!%p244_p9)  ;;  %v515_v26 = vld [vmem:[%s1412_s4 + $0x38] sm:$0xff] (!%p244_p9)  ;;  %v289_v27 = vld [vmem:[%s1409_s1 + $0x30] sm:$0xff] (!%p244_p9) }
  0x18   : > { %s1423_s14 = smov (!%p276_p10, %s897_s14), 3  ;;  %v711_v28 = vld [vmem:[#allocation2] sm:$0x1]  ;;  %v290_v29 = vld [vmem:[%s1409_s1 + $0x38] sm:$0xff] }
  0x19   : > { %s898_s19 = sshll.u32 %s1423_s14, 2 }
  0x1a   : > { %s279_s30 = scalar_lea.vmem %s1408_s0, %s898_s19 }
  0x1b   : > { %v282_v7 = vld [vmem:[%s279_s30] sm:$0xff]  ;;  %321 = vperm.xlu0 %998, %v295_v10   ;;  %326 = vperm.xlu1 %999, %v296_v11   ;;  %s896_s30 = sshll.u32 %s272_s25, 1 }
  0x1c   : > { %v340_v8 = vcombine.high %v282_v7, %v282_v7  ;;  %s274_s10 = scalar_lea.vmem [#allocation3], %s896_s30 }
  0x1d   : > { %s833_s14 = sshll.u32 %s274_s10, 4  ;;  %s1368_s14 = int_to_ptr.vmem [resolvable:$true] %s833_s14 }
  0x1e   : > { %899 = vmatprep.subr.msk.mxu0 %vm366_vm0, %v340_v8  ;;  %s1065_s19 = scalar_lea.vmem %s1368_s14, 32  ;;  %p1072_p0 = scmp.lt.s32.totalorder %s1368_s14, %s1070_s20 }
  0x1f   : > { %900 = vmatpush1.msk.msra.mxu0 %vm366_vm0, %v282_v7  ;;  %331 = vperm.xlu0 %998, %v297_v13   ;;  %p1066_p11 = scmp.ne.s32.totalorder %s1368_s14, %s1065_s19  ;;  %p1073_p1 = scmp.lt.s32.totalorder %s1071_s21, %s1065_s19 }
  0x20   : > { %901 = vmatmul.mubr.msk.f32.vlgmr.msra.gmra.mrb[0].mxu0 %vm341_vm1, %v283_v9  ;;  %336 = vperm.xlu1 %999, %v298_v14  }
  0x21   : > { %441 = vmatprep.mubr.f32.mxu0 %v1129_v1  ;;  %p1067_p12 = pnand %p1066_p11, %p1214_p5  ;;  %p1074_p2 = por %p1073_p1, %p1072_p0 }
  0x23   : > { %518 = vperm.xlu0 %998, %v508_v16   ;;  %p1068_p13 = pneg %p1067_p12 }
  0x24   : > { %902 = vmatmul.mubr.msk.f32.gmra.mrb[2].mxu0 %vm341_vm1, %v284_v12  ;;  %523 = vperm.xlu1 %999, %v509_v17  }
  0x25   : > { %447 = vmatprep.mubr.f32.mxu0 %v1129_v1  ;;  %p1075_p3 = pnand %p1074_p2, %p1068_p13 }
  0x27   : > { %528 = vperm.xlu0 %998, %v510_v19  }
  0x28   : > { %903 = vmatmul.mubr.msk.f32.gmra.mrb[4].mxu0 %vm341_vm1, %v285_v15  ;;  %533 = vperm.xlu1 %999, %v511_v20  }
  0x29   : > { %453 = vmatprep.mubr.f32.mxu0 %v1129_v1 }
  0x2b   : > { %538 = vperm.xlu0 %998, %v512_v22  }
  0x2c   : > { %904 = vmatmul.mubr.msk.f32.gmra.mrb[6].mxu0 %vm341_vm1, %v286_v18  ;;  %543 = vperm.xlu1 %999, %v513_v23  }
  0x2d   : > { %459 = vmatprep.mubr.f32.mxu0 %v1129_v1 }
  0x2f   : > { %548 = vperm.xlu0 %998, %v514_v25  }
  0x30   : > { %905 = vmatmul.mubr.msk.f32.gmra.mrb[8].mxu0 %vm341_vm1, %v287_v21  ;;  %553 = vperm.xlu1 %999, %v515_v26  }
  0x31   : > { %465 = vmatprep.mubr.f32.mxu0 %v1129_v1 }
  0x33   : > { %714 = vperm.xlu0 %998, %v711_v28  }
  0x34   : > { %906 = vmatmul.mubr.msk.f32.gmra.mrb[10].mxu0 %vm341_vm1, %v288_v24 }
  0x35   : > { %471 = vmatprep.mubr.f32.mxu0 %v1129_v1 }
  0x38   : > { %907 = vmatmul.mubr.msk.f32.gmra.mrb[12].mxu0 %vm341_vm1, %v289_v27 }
  0x39   : > { %477 = vmatprep.mubr.f32.mxu0 %v1129_v1 }
  0x3c   : > { %908 = vmatmul.mubr.msk.f32.gmra.mrb[14].mxu0 %vm341_vm1, %v290_v29 }
  0x3d   : > { %788 = vmatprep.mubr.f32.mxu0 %v1129_v1 }
  0x92   : > { %v302_v30 = vpop.permute.xlu0 %301  ;;  %v312_v39 = vpop.permute.xlu1 %311 }
  0x96   : > { %v307_v35 = vpop.permute.xlu0 %306  ;;  %v317_v45 = vpop.permute.xlu1 %316 }
  0x9a   : > { %v322_v52 = vpop.permute.xlu0 %321  ;;  %v327_v61 = vpop.permute.xlu1 %326 }
  0x9e   : > { %v332_v5 = vpop.permute.xlu0 %331 }
  0x9f   : > { %v337_v14 = vpop.permute.xlu1 %336 }
  0xf3   : > { %v437_v31 = vpop.f32.mrb[0].mxu0 }
  0xf4   : > { %v438_v32 = vadd.f32 %v437_v31, %v302_v30  ;;  %v439_v33 = vpop.f32.mrb[1].mxu0  ;;  %v500_v31 = vld [vmem:[%s1411_s3] sm:$0xff] }
  0xf5   : > { %v440_v34 = vadd.f32 %v439_v33, %v302_v30  ;;  %v502_v33 = vld [vmem:[%s1411_s3 + $0x10] sm:$0xff] }
  0xf6   : > { %1001 = vtanh.f32 %v438_v32  ;;  %v501_v32 = vld [vmem:[%s1411_s3 + $0x8] sm:$0xff] }
  0xf7   : > { %v443_v36 = vpop.f32.mrb[2].mxu0  ;;  %1003 = vtanh.f32 %v440_v34  ;;  %v503_v34 = vld [vmem:[%s1411_s3 + $0x18] sm:$0xff] }
  0xf8   : > { %v444_v37 = vadd.f32 %v443_v36, %v307_v35  ;;  %v445_v38 = vpop.f32.mrb[3].mxu0  ;;  %v505_v36 = vld [vmem:[%s1411_s3 + $0x28] sm:$0xff] }
  0xf9   : > { %v446_v40 = vadd.f32 %v445_v38, %v307_v35  ;;  %v504_v35 = vld [vmem:[%s1411_s3 + $0x20] sm:$0xff]  ;;  %v507_v38 = vld [vmem:[%s1411_s3 + $0x38] sm:$0xff] }
  0xfa   : > { %1005 = vtanh.f32 %v444_v37  ;;  %v506_v37 = vld [vmem:[%s1411_s3 + $0x30] sm:$0xff] }
  0xfb   : > { %1007 = vtanh.f32 %v446_v40  ;;  %v449_v41 = vpop.f32.mrb[4].mxu0 }
  0xfc   : > { %v450_v42 = vadd.f32 %v449_v41, %v312_v39  ;;  %v451_v43 = vpop.f32.mrb[5].mxu0 }
  0xfd   : > { %v452_v44 = vadd.f32 %v451_v43, %v312_v39  ;;  %v519_v39 = vpop.permute.xlu0 %518 }
  0xfe   : > { %1009 = vtanh.f32 %v450_v42 }
  0xff   : > { %v455_v46 = vpop.f32.mrb[6].mxu0  ;;  %1011 = vtanh.f32 %v452_v44  ;;  %v524_v44 = vpop.permute.xlu1 %523 }
 0x100   : > { %v456_v47 = vadd.f32 %v455_v46, %v317_v45  ;;  %v457_v48 = vpop.f32.mrb[7].mxu0  ;;  %v1002_v50 = vpop.eup %1001 }
 0x101   : > { %v458_v49 = vadd.f32 %v457_v48, %v317_v45  ;;  %v1004_v51 = vpop.eup %1003 }
 0x102   : > { %1013 = vtanh.f32 %v456_v47 }
 0x103   : > { %1015 = vtanh.f32 %v458_v49  ;;  %v461_v53 = vpop.f32.mrb[8].mxu0 }
 0x104   : > { %v1006_v54 = vpop.eup %1005  ;;  %v462_v55 = vadd.f32 %v461_v53, %v322_v52  ;;  %v463_v56 = vpop.f32.mrb[9].mxu0 }
 0x105   : > { %v1008_v57 = vpop.eup %1007  ;;  %v464_v58 = vadd.f32 %v463_v56, %v322_v52  ;;  %v926_v59 = vpack.c.bf16 %v1006_v54, %v1002_v50  ;;  %v534_v53 = vpop.permute.xlu1 %533 }
 0x106   : > { %v924_v60 = vpack.c.bf16 %v1008_v57, %v1004_v51  ;;  %1017 = vtanh.f32 %v462_v55 }
 0x107   : > { %v467_v62 = vpop.f32.mrb[10].mxu0  ;;  %1019 = vtanh.f32 %v464_v58 }
 0x108   : > { %v468_v63 = vadd.f32 %v467_v62, %v327_v61  ;;  %v469_v0 = vpop.f32.mrb[11].mxu0  ;;  %925 = vmatprep.subr.bf16.mxu1 %v924_v60  ;;  %v1010_v3 = vpop.eup %1009 }
 0x109   : > { %v470_v2 = vadd.f32 %v469_v0, %v327_v61  ;;  %927 = vmatpush1.bf16.msra.mxu1 %v926_v59  ;;  %v1012_v4 = vpop.eup %1011 }
 0x10a   : > { %1021 = vtanh.f32 %v468_v63 }
 0x10b   : > { %1023 = vtanh.f32 %v470_v2  ;;  %v473_v6 = vpop.f32.mrb[12].mxu0 }
 0x10c   : > { %v1014_v7 = vpop.eup %1013  ;;  %v474_v8 = vadd.f32 %v473_v6, %v332_v5  ;;  %v475_v9 = vpop.f32.mrb[13].mxu0 }
 0x10d   : > { %v1016_v10 = vpop.eup %1015  ;;  %v476_v11 = vadd.f32 %v475_v9, %v332_v5  ;;  %v930_v12 = vpack.c.bf16 %v1014_v7, %v1010_v3  ;;  %v544_v6 = vpop.permute.xlu1 %543 }
 0x10e   : > { %v928_v13 = vpack.c.bf16 %v1016_v10, %v1012_v4  ;;  %1025 = vtanh.f32 %v474_v8 }
 0x10f   : > { %v479_v15 = vpop.f32.mrb[14].mxu0  ;;  %1027 = vtanh.f32 %v476_v11 }
 0x110   : > { %v480_v16 = vadd.f32 %v479_v15, %v337_v14  ;;  %v481_v17 = vpop.f32.mrb[15].mxu0  ;;  %929 = vmatprep.subr.bf16.mxu1 %v928_v13  ;;  %v1018_v19 = vpop.eup %1017 }
 0x111   : > { %v482_v18 = vadd.f32 %v481_v17, %v337_v14  ;;  %931 = vmatpush1.bf16.msra.mxu1 %v930_v12  ;;  %v1020_v20 = vpop.eup %1019 }
 0x112   : > { %1029 = vtanh.f32 %v480_v16 }
 0x113   : > { %1031 = vtanh.f32 %v482_v18 }
 0x114   : > { %v1022_v21 = vpop.eup %1021 }
 0x115   : > { %v1024_v22 = vpop.eup %1023  ;;  %v934_v23 = vpack.c.bf16 %v1022_v21, %v1018_v19 }
 0x116   : > { %v932_v24 = vpack.c.bf16 %v1024_v22, %v1020_v20  ;;  %v554_v22 = vpop.permute.xlu1 %553 }
 0x118   : > { %933 = vmatprep.subr.bf16.mxu1 %v932_v24  ;;  %v1026_v25 = vpop.eup %1025 }
 0x119   : > { %935 = vmatpush1.bf16.msra.mxu1 %v934_v23  ;;  %v1028_v26 = vpop.eup %1027 }
 0x11c   : > { %v1030_v27 = vpop.eup %1029 }
 0x11d   : > { %v1032_v28 = vpop.eup %1031  ;;  %v938_v29 = vpack.c.bf16 %v1030_v27, %v1026_v25 }
 0x11e   : > { %v936_v30 = vpack.c.bf16 %v1032_v28, %v1028_v26 }
 0x120   : > { %937 = vmatprep.subr.bf16.mxu1 %v936_v30 }
 0x121   : > { %939 = vmatpush1.bf16.msra.mxu1 %v938_v29 }
 0x124   : > { %909 = vmatmul.mubr.msk.f32.vlgmr.msra.gmra.mrb[0].mxu1 %vm556_vm2, %v500_v31 }
 0x125   : > { %651 = vmatprep.mubr.f32.mxu1 %v1129_v1 }
 0x128   : > { %910 = vmatmul.mubr.msk.f32.gmra.mrb[2].mxu1 %vm556_vm2, %v501_v32 }
 0x129   : > { %657 = vmatprep.mubr.f32.mxu1 %v1129_v1 }
 0x12c   : > { %911 = vmatmul.mubr.msk.f32.gmra.mrb[4].mxu1 %vm556_vm2, %v502_v33 }
 0x12d   : > { %663 = vmatprep.mubr.f32.mxu1 %v1129_v1 }
 0x130   : > { %912 = vmatmul.mubr.msk.f32.gmra.mrb[6].mxu1 %vm556_vm2, %v503_v34 }
 0x131   : > { %669 = vmatprep.mubr.f32.mxu1 %v1129_v1 }
 0x134   : > { %913 = vmatmul.mubr.msk.f32.gmra.mrb[8].mxu1 %vm556_vm2, %v504_v35 }
 0x135   : > { %675 = vmatprep.mubr.f32.mxu1 %v1129_v1 }
 0x138   : > { %914 = vmatmul.mubr.msk.f32.gmra.mrb[10].mxu1 %vm556_vm2, %v505_v36 }
 0x139   : > { %681 = vmatprep.mubr.f32.mxu1 %v1129_v1 }
 0x13c   : > { %915 = vmatmul.mubr.msk.f32.gmra.mrb[12].mxu1 %vm556_vm2, %v506_v37 }
 0x13d   : > { %687 = vmatprep.mubr.f32.mxu1 %v1129_v1  ;;  %v529_v1 = vpop.permute.xlu0 %528 }
 0x140   : > { %916 = vmatmul.mubr.msk.f32.gmra.mrb[14].mxu1 %vm556_vm2, %v507_v38 }
 0x141   : > { %v539_v60 = vpop.permute.xlu0 %538 }
 0x145   : > { %v549_v13 = vpop.permute.xlu0 %548 }
 0x1f7   : > { %v647_v40 = vpop.f32.mrb[0].mxu1 }
 0x1f8   : > { %v648_v41 = vadd.f32 %v647_v40, %v519_v39  ;;  %v649_v42 = vpop.f32.mrb[1].mxu1  ;;  %v717_v40 = vlaneseq }
 0x1f9   : > { %v650_v43 = vadd.f32 %v649_v42, %v519_v39  ;;  %v710_v39 = vld [vmem:[%s1413_s5] sm:$0x1]  ;;  %v1131_v42 = vmov 1966171168  }
 0x1fa   : > { %1033 = vtanh.f32 %v648_v41  ;;  %v718_v41 = vshrl.u32 %v717_v40, 7  ;;  %vm815_vm3 = vcmp.lt.s32.totalorder %v717_v40, 256 }
 0x1fb   : > { %v653_v45 = vpop.f32.mrb[2].mxu1  ;;  %1035 = vtanh.f32 %v650_v43  ;;  %v799_v43 = vunpack.c.l.s4 %v1131_v42 }
 0x1fc   : > { %v654_v46 = vadd.f32 %v653_v45, %v524_v44  ;;  %v655_v47 = vpop.f32.mrb[3].mxu1  ;;  %v715_v45 = vpop.permute.xlu0 %714 }
 0x1fd   : > { %v656_v48 = vadd.f32 %v655_v47, %v524_v44  ;;  %v719_v44 = vsub.s32 0, %v718_v41 }
 0x1fe   : > { %1037 = vtanh.f32 %v654_v46  ;;  %v800_v46 = vunpack.c.0.s8 %v799_v43 }
 0x1ff   : > { %1039 = vtanh.f32 %v656_v48  ;;  %v659_v49 = vpop.f32.mrb[4].mxu1  ;;  %v720_v47 = vrot.slane %v715_v45, %v719_v44 }
 0x200   : > { %v660_v50 = vadd.f32 %v659_v49, %v529_v1  ;;  %v661_v51 = vpop.f32.mrb[5].mxu1 }
 0x201   : > { %v662_v52 = vadd.f32 %v661_v51, %v529_v1  ;;  %v803_v51 = vsub.s32 %v800_v46, %v718_v41 }
 0x202   : > { %1041 = vtanh.f32 %v660_v50 }
 0x203   : > { %v665_v54 = vpop.f32.mrb[6].mxu1  ;;  %1043 = vtanh.f32 %v662_v52 }
 0x204   : > { %v666_v55 = vadd.f32 %v665_v54, %v534_v53  ;;  %v667_v56 = vpop.f32.mrb[7].mxu1  ;;  %v1034_v58 = vpop.eup %1033 }
 0x205   : > { %v668_v57 = vadd.f32 %v667_v56, %v534_v53  ;;  %v1036_v59 = vpop.eup %1035 }
 0x206   : > { %1045 = vtanh.f32 %v666_v55 }
 0x207   : > { %1047 = vtanh.f32 %v668_v57  ;;  %v671_v61 = vpop.f32.mrb[8].mxu1 }
 0x208   : > { %v1038_v62 = vpop.eup %1037  ;;  %v672_v63 = vadd.f32 %v671_v61, %v539_v60  ;;  %v673_v0 = vpop.f32.mrb[9].mxu1 }
 0x209   : > { %v1040_v2 = vpop.eup %1039  ;;  %v674_v3 = vadd.f32 %v673_v0, %v539_v60  ;;  %v942_v4 = vpack.c.bf16 %v1038_v62, %v1034_v58 }
 0x20a   : > { %v940_v5 = vpack.c.bf16 %v1040_v2, %v1036_v59  ;;  %1049 = vtanh.f32 %v672_v63 }
 0x20b   : > { %v677_v7 = vpop.f32.mrb[10].mxu1  ;;  %1051 = vtanh.f32 %v674_v3 }
 0x20c   : > { %v678_v8 = vadd.f32 %v677_v7, %v544_v6  ;;  %v679_v9 = vpop.f32.mrb[11].mxu1  ;;  %941 = vmatprep.subr.bf16.mxu0 %v940_v5  ;;  %v1042_v11 = vpop.eup %1041 }
 0x20d   : > { %v680_v10 = vadd.f32 %v679_v9, %v544_v6  ;;  %943 = vmatpush1.bf16.msra.mxu0 %v942_v4  ;;  %v1044_v12 = vpop.eup %1043 }
 0x20e   : > { %1053 = vtanh.f32 %v678_v8 }
 0x20f   : > { %1055 = vtanh.f32 %v680_v10  ;;  %v683_v14 = vpop.f32.mrb[12].mxu1 }
 0x210   : > { %v1046_v15 = vpop.eup %1045  ;;  %v684_v16 = vadd.f32 %v683_v14, %v549_v13  ;;  %v685_v17 = vpop.f32.mrb[13].mxu1 }
 0x211   : > { %v1048_v18 = vpop.eup %1047  ;;  %v686_v19 = vadd.f32 %v685_v17, %v549_v13  ;;  %v946_v20 = vpack.c.bf16 %v1046_v15, %v1042_v11 }
 0x212   : > { %v944_v21 = vpack.c.bf16 %v1048_v18, %v1044_v12  ;;  %1057 = vtanh.f32 %v684_v16 }
 0x213   : > { %v689_v23 = vpop.f32.mrb[14].mxu1  ;;  %1059 = vtanh.f32 %v686_v19 }
 0x214   : > { %v690_v24 = vadd.f32 %v689_v23, %v554_v22  ;;  %v691_v25 = vpop.f32.mrb[15].mxu1  ;;  %945 = vmatprep.subr.bf16.mxu0 %v944_v21  ;;  %v1050_v27 = vpop.eup %1049 }
 0x215   : > { %v692_v26 = vadd.f32 %v691_v25, %v554_v22  ;;  %947 = vmatpush1.bf16.msra.mxu0 %v946_v20  ;;  %v1052_v28 = vpop.eup %1051 }
 0x216   : > { %1061 = vtanh.f32 %v690_v24 }
 0x217   : > { %1063 = vtanh.f32 %v692_v26 }
 0x218   : > { %v1054_v29 = vpop.eup %1053 }
 0x219   : > { %v1056_v30 = vpop.eup %1055  ;;  %v950_v31 = vpack.c.bf16 %v1054_v29, %v1050_v27 }
 0x21a   : > { %v948_v32 = vpack.c.bf16 %v1056_v30, %v1052_v28 }
 0x21c   : > { %949 = vmatprep.subr.bf16.mxu0 %v948_v32  ;;  %v1058_v33 = vpop.eup %1057 }
 0x21d   : > { %951 = vmatpush1.bf16.msra.mxu0 %v950_v31  ;;  %v1060_v34 = vpop.eup %1059 }
 0x220   : > { %v1062_v35 = vpop.eup %1061 }
 0x221   : > { %v1064_v36 = vpop.eup %1063  ;;  %v954_v37 = vpack.c.bf16 %v1062_v35, %v1058_v33 }
 0x222   : > { %v952_v38 = vpack.c.bf16 %v1064_v36, %v1060_v34 }
 0x224   : > { %953 = vmatprep.subr.bf16.mxu0 %v952_v38 }
 0x225   : > { %955 = vmatpush1.bf16.msra.mxu0 %v954_v37 }
 0x228   : > { %917 = vmatmul.mubr.msk.f32.vlgmr.msra.gmra.mrb[16].mxu0 %vm556_vm2, %v710_v39 }
 0x2fb   : > { %v790_v48 = vpop.f32.mrb[16].mxu0 }
 0x2fc   : > { %v791_v1 = vadd.f32 %v790_v48, %v720_v47  ;;  %v792_v49 = vpop.f32.mrb[17].mxu0 }
 0x2fd   : > { %v793_v50 = vadd.f32 %v792_v49, %v720_v47 }
 0x2ff   : > { %v797_v52 = vcombine.low %v791_v1, %v793_v50 }
 0x301   : > { %v804_v53 = vrot.slane %v797_v52, %v803_v51 }
 0x303   : > { %v811_v54 = vrot.slane %v804_v53, %v803_v51 }
 0x305   : > { %817 = vst.msk [vmem:[%s274_s10] sm:$0x3] %vm815_vm3, %v811_v54 }
 0x306   : > { %1078 = shalt.err (!%p1075_p3)
}
 0x307   : > { %s1079_s22 = scalar_lea.hbm %s1366_s17, 32  ;;  %s1083_s25 = scalar_lea.hbm %s1415_s7, 64 }
 0x308   : > { %p1080_p4 = scmp.ne.s32.totalorder %s1366_s17, %s1079_s22  ;;  %p1084_p9 = scmp.lt.u32.totalorder %s1366_s17, %s1415_s7 }
 0x309   : > { %p1085_p10 = scmp.lt.u32.totalorder %s1083_s25, %s1079_s22  ;;  %p1087_p12 = scmp.lt.u32.totalorder %s1079_s22, %s1366_s17 }
 0x30a   : > { %p1081_p7 = pnand %p1080_p4, %p1214_p5 }
 0x30b   : > { %p1086_p11 = por %p1085_p10, %p1084_p9 }
 0x30c   : > { %p1082_p8 = pneg %p1081_p7 }
 0x30d   : > { %p1088_p13 = por %p1087_p12, %p1086_p11 }
 0x30f   : > { %p1089_p0 = pnand %p1088_p13, %p1082_p8 }
 0x311   : > { %1092 = shalt.err (!%p1089_p0)
}
 0x312   : > { %956 = dma.vmem_to_hbm [thread:$0]  (%p1214_p5), %s1368_s14, 32, %s1366_s17, %s819_s18  }
 0x313 PF: > { %p962_p1 = scmp.ge.s32.totalorder %s1127_s29, 2  ;;  %s845_s10 = sand.u32 1, %s1115_s26  }
 0x314   : > { %s846_s15 = scalar_lea.sflag [#allocation4], %s845_s10 }
 0x315   : > { %p959_p2 = pnand %p962_p1, %p1218_p6 }
 0x317   : > { %1110 = dma.done.wait (!%p959_p2), %s846_s15, 32  }
 0x318   : > { %1112 = vsyncadd (!%p959_p2), %s846_s15, 4294967264  ;;  %p19_p3 = scmp.ge.s32.totalorder %s1201_s8, 4   ;;  %s1418_s26 = smov %s1119_s27 }
 0x319   : > { %s1419_s27 = smov %s1123_s28  ;;  %s1420_s28 = smov %s1212_s11 }
 0x31a   : > { %s1421_s29 = smov %s1201_s8  ;;  %21 = sbr.rel (!%p19_p3) target bundleno = 6 (0x6), region = 83 }
 0x321   :  { %851 = vsyncpa [#allocation4], 1 }
 0x322   :  { %853 = vsyncpa [#allocation4 + $0x1], 1 }

</bundles_post_ra>
